<compile_context>
chip_gen: v7x
topology: tpu7x:2x2x1
jax: 0.10.0
libtpu: 0.0.40
codegen_flags: <defaults>
</compile_context>

<pallas_src>
import functools
import numpy as np
import jax
import jax.numpy as jnp
from jax import lax
from jax.experimental import pallas as pl
from jax.experimental.pallas import tpu as pltpu


def _round_up(a, b):
    return ((a + b - 1) // b) * b


# ----------------------------------------------------------------------------
# Irreps bookkeeping (mirrors E3PerSpeciesScaleShift.__init__ without e3nn).
# Each irrep is (mul, (l, parity)); parity = +1 ('e') / -1 ('o'); ir.dim = 2l+1.
# ----------------------------------------------------------------------------
def build_meta(irreps):
    shift_index = []
    scale_index = []
    num_scalar = 0
    start = 0
    start_scalar = 0
    for mul, (l, p) in irreps:
        ir_dim = 2 * l + 1
        if l == 0 and p == 1:          # '0e'
            num_scalar += mul
            shift_index += list(range(start_scalar, start_scalar + mul))
            start_scalar += mul
        else:
            shift_index += [-1] * (mul * ir_dim)
        for _ in range(mul):
            scale_index += [start] * ir_dim
            start += 1
    return dict(
        shift_index=np.asarray(shift_index, dtype=np.int64),
        scale_index=np.asarray(scale_index, dtype=np.int64),
        num_scalar=num_scalar,
        num_irreps=start,
        dim=len(scale_index),
    )


# ----------------------------------------------------------------------------
# Fold the static feature gathers into a block-diagonal per-(slot, species)
# table (host/glue, tiny: (P*T, n_groups*128) floats).
#   group 0 lanes [p*D:(p+1)*D] of row p*T+t : scale row for type t   (if has_scales)
#   group 1 lanes [p*D:(p+1)*D] of row p*T+t : shift row for type t   (if has_shifts;
#                                              group 0 when shift-only)
# ----------------------------------------------------------------------------
def build_packed_table(meta, scales=None, shifts=None, *, pack, dtype=jnp.float32):
    D = meta["dim"]
    P = pack
    packed_dim = P * D
    group_w = _round_up(packed_dim, 128)      # vreg-aligned column group width
    scale_idx = meta["scale_index"]
    shift_idx = meta["shift_index"]
    has_scales = scales is not None
    has_shifts = shifts is not None
    assert has_scales or has_shifts
    T = (scales if has_scales else shifts).shape[0]

    def block_diag(rows_TD):                  # (T, D) -> (P*T, group_w) block-diagonal
        blk = jnp.zeros((P, T, group_w), dtype)
        for p in range(P):
            blk = blk.at[p, :, p * D:(p + 1) * D].set(rows_TD)
        return blk.reshape(P * T, group_w)

    groups = []
    if has_scales:
        sc_rows = jnp.asarray(scales, dtype)[:, scale_idx]                 # (T, D)
        groups.append(block_diag(sc_rows))
    if has_shifts:
        pos = np.where(shift_idx >= 0)[0]
        sh_rows = jnp.zeros((T, D), dtype)
        sh_rows = sh_rows.at[:, pos].set(jnp.asarray(shifts, dtype)[:, shift_idx[pos]])
        groups.append(block_diag(sh_rows))                                 # 0 at non-0e lanes
    table = jnp.concatenate(groups, axis=1) if len(groups) > 1 else groups[0]
    return table, group_w


# ----------------------------------------------------------------------------
# Pallas kernel: build a (rows, P*T) one-hot over (slot, species), one fused
# MXU matmul gathers the per-lane scale+shift rows, then a single VPU FMA.
# ----------------------------------------------------------------------------
def _scale_shift_kernel(species_ref, x_ref, table_ref, o_ref, *,
                        packed_dim, group_w, has_scales, has_shifts):
    tile = x_ref.shape[0]
    P = species_ref.shape[1]
    PT = table_ref.shape[0]
    num_types = PT // P

    sp = species_ref[...]                                                   # (tile, P) int32
    col = lax.broadcasted_iota(jnp.int32, (tile, PT), 1)
    onehot = jnp.zeros((tile, PT), jnp.float32)
    for p in range(P):                                                      # static, P = 8
        slot_p = sp[:, p:p + 1] + p * num_types                            # (tile, 1)
        onehot = onehot + (col == slot_p).astype(jnp.float32)              # exact 0/1

    # One fused gather: (tile, P*T) @ (P*T, n_groups*128) -> (tile, n_groups*128)
    res = jnp.dot(onehot, table_ref[...], preferred_element_type=jnp.float32)

    x = x_ref[...].astype(jnp.float32)
    if has_scales and has_shifts:
        out = x * res[:, :packed_dim] + res[:, group_w:group_w + packed_dim]
    elif has_scales:
        out = x * res[:, :packed_dim]
    else:  # shift only (zeros at non-0e lanes leave those lanes untouched)
        out = x + res[:, :packed_dim]
    o_ref[...] = out.astype(o_ref.dtype)


# ----------------------------------------------------------------------------
# Wrapper: zero-cost lane-dense repack + tiled pallas_call over packed rows.
# ----------------------------------------------------------------------------
def e3_per_species_scale_shift(x, species, scales=None, shifts=None, *,
                               meta, tile_rows=4096):
    """x: [N, D] float, species: [N] int, scales: [T, num_irreps], shifts: [T, num_scalar]."""
    if scales is None and shifts is None:
        return x                                   # module forward is identity
    N, D = x.shape
    assert D == meta["dim"]
    has_scales = scales is not None
    has_shifts = shifts is not None

    P = max(1, 128 // D)                           # atoms packed per row (8 for D=15)
    packed_dim = P * D                             # 120 lanes per packed row
    table, group_w = build_packed_table(meta, scales=scales, shifts=shifts,
                                        pack=P, dtype=jnp.float32)
    PT, cols = table.shape

    # Pad atom count to a multiple of P (only non-free path; skipped when N % P == 0).
    n_pad = _round_up(N, P)
    if n_pad != N:
        x_in = jnp.pad(x, ((0, n_pad - N), (0, 0)))
        sp_in = jnp.pad(species.astype(jnp.int32), (0, n_pad - N))  # pad with type 0
    else:
        x_in = x
        sp_in = species.astype(jnp.int32)

    rows = n_pad // P
    x_rows = x_in.reshape(rows, packed_dim)        # zero-cost row-major view
    sp_rows = sp_in.reshape(rows, P)

    tile_rows = int(min(tile_rows, rows))
    if tile_rows < rows:                           # (8,128) rule: sublane dim multiple of 8
        tile_rows = max(8, (tile_rows // 8) * 8)
    grid = (pl.cdiv(rows, tile_rows),)

    kernel = functools.partial(_scale_shift_kernel, packed_dim=packed_dim,
                               group_w=group_w, has_scales=has_scales,
                               has_shifts=has_shifts)

    grid_spec = pltpu.PrefetchScalarGridSpec(
        num_scalar_prefetch=0,
        grid=grid,
        in_specs=[
            pl.BlockSpec((tile_rows, P), lambda i: (i, 0)),           # packed species
            pl.BlockSpec((tile_rows, packed_dim), lambda i: (i, 0)),  # packed x
            pl.BlockSpec((PT, cols), lambda i: (0, 0)),               # table resident in VMEM
        ],
        out_specs=pl.BlockSpec((tile_rows, packed_dim), lambda i: (i, 0)),
    )

    itemsize = jnp.dtype(x.dtype).itemsize
    cost = pl.CostEstimate(                        # purely HBM-bound; helps XLA scheduling
        flops=int(2 * n_pad * D + 2 * rows * PT * cols),
        transcendentals=0,
        bytes_accessed=int(2 * n_pad * D * itemsize + 4 * n_pad + 4 * table.size),
    )

    out_rows = pl.pallas_call(
        kernel,
        out_shape=jax.ShapeDtypeStruct((rows, packed_dim), x.dtype),
        grid_spec=grid_spec,
        compiler_params=pltpu.CompilerParams(
            dimension_semantics=("parallel",),     # independent row tiles (2 TCs on v7x)
            vmem_limit_bytes=48 * 1024 * 1024,     # ~22 MiB used at tile_rows=4096
        ),
        cost_estimate=cost,
    )(sp_rows, x_rows, table)

    out = out_rows.reshape(n_pad, D)               # zero-cost view back to per-atom layout
    return out[:N] if n_pad != N else out
    # NOTE: out-of-range species (e.g. -1 padding atoms) give an all-zero one-hot row,
    # yielding 0 (scale path) / unshifted x (shift path) rather than a gather-on-garbage.


# ----------------------------------------------------------------------------
# Pure-JAX reference (direct transcription of the PyTorch forward)
# ----------------------------------------------------------------------------
def ref_forward(x, species, scales, shifts, meta):
    scale_idx = np.asarray(meta["scale_index"])
    shift_idx = np.asarray(meta["shift_index"])
    out = x
    if scales is not None:
        out = scales[species][:, scale_idx] * out
    if shifts is not None:
        pos = np.where(shift_idx >= 0)[0]
        sh = shifts[species][:, shift_idx[pos]]
        out = out.at[:, pos].add(sh)
    return out


if __name__ == "__main__":
    # irreps_in = "4x0e + 2x1o + 1x2e"  -> D = 4*1 + 2*3 + 1*5 = 15
    irreps = [(4, (0, 1)), (2, (1, -1)), (1, (2, 1))]
    meta = build_meta(irreps)
    D = meta["dim"]                # 15
    num_types = 4
    N = 64                         # number of atoms (small; multiple of the 8-atom pack)

    key = jax.random.PRNGKey(0)
    kx, ks, ksc, ksh = jax.random.split(key, 4)
    x = jax.random.normal(kx, (N, D), dtype=jnp.float32)
    species = jax.random.randint(ks, (N,), 0, num_types, dtype=jnp.int32)
    scales = jax.random.normal(ksc, (num_types, meta["num_irreps"]), dtype=jnp.float32)
    shifts = jax.random.normal(ksh, (num_types, meta["num_scalar"]), dtype=jnp.float32)

    # --- scales + shifts ---
    out_b = jax.block_until_ready(
        e3_per_species_scale_shift(x, species, scales=scales, shifts=shifts, meta=meta))
    ref_b = ref_forward(x, species, scales, shifts, meta)
    assert out_b.shape == (N, D) and out_b.dtype == jnp.float32
    assert jnp.allclose(out_b, ref_b, atol=1e-5, rtol=1e-5), "mismatch (scale+shift)"

    # --- scales only ---
    out_s = jax.block_until_ready(
        e3_per_species_scale_shift(x, species, scales=scales, shifts=None, meta=meta))
    assert jnp.allclose(out_s, ref_forward(x, species, scales, None, meta),
                        atol=1e-5, rtol=1e-5), "mismatch (scale only)"

    # --- shifts only ---
    out_h = jax.block_until_ready(
        e3_per_species_scale_shift(x, species, scales=None, shifts=shifts, meta=meta))
    assert jnp.allclose(out_h, ref_forward(x, species, None, shifts, meta),
                        atol=1e-5, rtol=1e-5), "mismatch (shift only)"

    # --- N not a multiple of the pack (exercises wrapper pad/slice path) ---
    N2 = 19
    x2, sp2 = x[:N2], species[:N2]
    out2 = jax.block_until_ready(
        e3_per_species_scale_shift(x2, sp2, scales=scales, shifts=shifts, meta=meta))
    assert jnp.allclose(out2, ref_forward(x2, sp2, scales, shifts, meta),
                        atol=1e-5, rtol=1e-5), "mismatch (padded N)"

    print("KERNEL_OK")
</pallas_src>

<mosaic_0001>
module attributes {stable_mosaic.version = 11 : i64} {
  func.func @_scale_shift_kernel(%arg0: i32, %arg1: memref<8x8xi32, #tpu.memory_space<vmem>>, %arg2: memref<8x120xf32, #tpu.memory_space<vmem>>, %arg3: memref<32x256xf32, #tpu.memory_space<vmem>>, %arg4: memref<8x120xf32, #tpu.memory_space<vmem>>) attributes {dimension_semantics = [#tpu.dimension_semantics<parallel>], iteration_bounds = array<i64: 1>, scalar_prefetch = 0 : i64, scratch_operands = 0 : i64, tpu.core_type = #tpu.core_type<tc>, window_params = [{transform_indices = @transform_0, window_bounds = array<i64: 8, 8>}, {transform_indices = @transform_1, window_bounds = array<i64: 8, 120>}, {pipeline_mode = #tpu.pipeline_mode<synchronous>, transform_indices = @transform_2, window_bounds = array<i64: 32, 256>}, {transform_indices = @transform_3, window_bounds = array<i64: 8, 120>}]} {
    %c0 = arith.constant 0 : index
    %c0_0 = arith.constant 0 : index
    %0 = vector.load %arg1[%c0, %c0_0] : memref<8x8xi32, #tpu.memory_space<vmem>>, vector<8x8xi32>
    %1 = tpu.iota {dimensions = array<i32: 1>} : vector<8x32xi32>
    %cst = arith.constant 0.000000e+00 : f32
    %2 = vector.broadcast %cst : f32 to vector<8x32xf32>
    %3 = vector.extract_strided_slice %0 {offsets = [0, 0], sizes = [8, 1], strides = [1, 1]} : vector<8x8xi32> to vector<8x1xi32>
    %c0_i32 = arith.constant 0 : i32
    %4 = vector.broadcast %c0_i32 : i32 to vector<8x1xi32>
    %5 = arith.addi %3, %4 : vector<8x1xi32>
    %6 = vector.broadcast %5 : vector<8x1xi32> to vector<8x32xi32>
    %7 = arith.cmpi eq, %1, %6 : vector<8x32xi32>
    %8 = arith.extui %7 : vector<8x32xi1> to vector<8x32xi32>
    %9 = arith.sitofp %8 : vector<8x32xi32> to vector<8x32xf32>
    %10 = arith.addf %2, %9 : vector<8x32xf32>
    %11 = vector.extract_strided_slice %0 {offsets = [0, 1], sizes = [8, 1], strides = [1, 1]} : vector<8x8xi32> to vector<8x1xi32>
    %c4_i32 = arith.constant 4 : i32
    %12 = vector.broadcast %c4_i32 : i32 to vector<8x1xi32>
    %13 = arith.addi %11, %12 : vector<8x1xi32>
    %14 = vector.broadcast %13 : vector<8x1xi32> to vector<8x32xi32>
    %15 = arith.cmpi eq, %1, %14 : vector<8x32xi32>
    %16 = arith.extui %15 : vector<8x32xi1> to vector<8x32xi32>
    %17 = arith.sitofp %16 : vector<8x32xi32> to vector<8x32xf32>
    %18 = arith.addf %10, %17 : vector<8x32xf32>
    %19 = vector.extract_strided_slice %0 {offsets = [0, 2], sizes = [8, 1], strides = [1, 1]} : vector<8x8xi32> to vector<8x1xi32>
    %c8_i32 = arith.constant 8 : i32
    %20 = vector.broadcast %c8_i32 : i32 to vector<8x1xi32>
    %21 = arith.addi %19, %20 : vector<8x1xi32>
    %22 = vector.broadcast %21 : vector<8x1xi32> to vector<8x32xi32>
    %23 = arith.cmpi eq, %1, %22 : vector<8x32xi32>
    %24 = arith.extui %23 : vector<8x32xi1> to vector<8x32xi32>
    %25 = arith.sitofp %24 : vector<8x32xi32> to vector<8x32xf32>
    %26 = arith.addf %18, %25 : vector<8x32xf32>
    %27 = vector.extract_strided_slice %0 {offsets = [0, 3], sizes = [8, 1], strides = [1, 1]} : vector<8x8xi32> to vector<8x1xi32>
    %c12_i32 = arith.constant 12 : i32
    %28 = vector.broadcast %c12_i32 : i32 to vector<8x1xi32>
    %29 = arith.addi %27, %28 : vector<8x1xi32>
    %30 = vector.broadcast %29 : vector<8x1xi32> to vector<8x32xi32>
    %31 = arith.cmpi eq, %1, %30 : vector<8x32xi32>
    %32 = arith.extui %31 : vector<8x32xi1> to vector<8x32xi32>
    %33 = arith.sitofp %32 : vector<8x32xi32> to vector<8x32xf32>
    %34 = arith.addf %26, %33 : vector<8x32xf32>
    %35 = vector.extract_strided_slice %0 {offsets = [0, 4], sizes = [8, 1], strides = [1, 1]} : vector<8x8xi32> to vector<8x1xi32>
    %c16_i32 = arith.constant 16 : i32
    %36 = vector.broadcast %c16_i32 : i32 to vector<8x1xi32>
    %37 = arith.addi %35, %36 : vector<8x1xi32>
    %38 = vector.broadcast %37 : vector<8x1xi32> to vector<8x32xi32>
    %39 = arith.cmpi eq, %1, %38 : vector<8x32xi32>
    %40 = arith.extui %39 : vector<8x32xi1> to vector<8x32xi32>
    %41 = arith.sitofp %40 : vector<8x32xi32> to vector<8x32xf32>
    %42 = arith.addf %34, %41 : vector<8x32xf32>
    %43 = vector.extract_strided_slice %0 {offsets = [0, 5], sizes = [8, 1], strides = [1, 1]} : vector<8x8xi32> to vector<8x1xi32>
    %c20_i32 = arith.constant 20 : i32
    %44 = vector.broadcast %c20_i32 : i32 to vector<8x1xi32>
    %45 = arith.addi %43, %44 : vector<8x1xi32>
    %46 = vector.broadcast %45 : vector<8x1xi32> to vector<8x32xi32>
    %47 = arith.cmpi eq, %1, %46 : vector<8x32xi32>
    %48 = arith.extui %47 : vector<8x32xi1> to vector<8x32xi32>
    %49 = arith.sitofp %48 : vector<8x32xi32> to vector<8x32xf32>
    %50 = arith.addf %42, %49 : vector<8x32xf32>
    %51 = vector.extract_strided_slice %0 {offsets = [0, 6], sizes = [8, 1], strides = [1, 1]} : vector<8x8xi32> to vector<8x1xi32>
    %c24_i32 = arith.constant 24 : i32
    %52 = vector.broadcast %c24_i32 : i32 to vector<8x1xi32>
    %53 = arith.addi %51, %52 : vector<8x1xi32>
    %54 = vector.broadcast %53 : vector<8x1xi32> to vector<8x32xi32>
    %55 = arith.cmpi eq, %1, %54 : vector<8x32xi32>
    %56 = arith.extui %55 : vector<8x32xi1> to vector<8x32xi32>
    %57 = arith.sitofp %56 : vector<8x32xi32> to vector<8x32xf32>
    %58 = arith.addf %50, %57 : vector<8x32xf32>
    %59 = vector.extract_strided_slice %0 {offsets = [0, 7], sizes = [8, 1], strides = [1, 1]} : vector<8x8xi32> to vector<8x1xi32>
    %c28_i32 = arith.constant 28 : i32
    %60 = vector.broadcast %c28_i32 : i32 to vector<8x1xi32>
    %61 = arith.addi %59, %60 : vector<8x1xi32>
    %62 = vector.broadcast %61 : vector<8x1xi32> to vector<8x32xi32>
    %63 = arith.cmpi eq, %1, %62 : vector<8x32xi32>
    %64 = arith.extui %63 : vector<8x32xi1> to vector<8x32xi32>
    %65 = arith.sitofp %64 : vector<8x32xi32> to vector<8x32xf32>
    %66 = arith.addf %58, %65 : vector<8x32xf32>
    %c0_1 = arith.constant 0 : index
    %c0_2 = arith.constant 0 : index
    %67 = vector.load %arg3[%c0_1, %c0_2] : memref<32x256xf32, #tpu.memory_space<vmem>>, vector<32x256xf32>
    %cst_3 = arith.constant dense<0.000000e+00> : vector<8x256xf32>
    %68 = tpu.matmul %66, %67, %cst_3 {dimension_numbers = #tpu.dot_dimension_numbers<[1], [0], [0], [1], [0, 0, 1, 1], [], []>} : vector<8x32xf32>, vector<32x256xf32>, vector<8x256xf32> -> vector<8x256xf32>
    %c0_4 = arith.constant 0 : index
    %c0_5 = arith.constant 0 : index
    %69 = vector.load %arg2[%c0_4, %c0_5] : memref<8x120xf32, #tpu.memory_space<vmem>>, vector<8x120xf32>
    %70 = vector.extract_strided_slice %68 {offsets = [0, 0], sizes = [8, 120], strides = [1, 1]} : vector<8x256xf32> to vector<8x120xf32>
    %71 = arith.mulf %69, %70 : vector<8x120xf32>
    %72 = vector.extract_strided_slice %68 {offsets = [0, 128], sizes = [8, 120], strides = [1, 1]} : vector<8x256xf32> to vector<8x120xf32>
    %73 = arith.addf %71, %72 : vector<8x120xf32>
    %c0_6 = arith.constant 0 : index
    %c0_7 = arith.constant 0 : index
    %74 = vector.load %arg4[%c0_6, %c0_7] : memref<8x120xf32, #tpu.memory_space<vmem>>, vector<8x120xf32>
    tpu.vector_store %arg4[%c0_6, %c0_7], %73 {strides = array<i32>} : memref<8x120xf32, #tpu.memory_space<vmem>>, vector<8x120xf32>,
    return
  }
  func.func @transform_0(%arg0: i32) -> (i32, i32) {
    %c0_i32 = arith.constant 0 : i32
    %c0_i32_0 = arith.constant 0 : i32
    return %arg0, %c0_i32 : i32, i32
  }
  func.func @transform_1(%arg0: i32) -> (i32, i32) {
    %c0_i32 = arith.constant 0 : i32
    %c0_i32_0 = arith.constant 0 : i32
    return %arg0, %c0_i32 : i32, i32
  }
  func.func @transform_2(%arg0: i32) -> (i32, i32) {
    %c0_i32 = arith.constant 0 : i32
    %c0_i32_0 = arith.constant 0 : i32
    %c0_i32_1 = arith.constant 0 : i32
    return %c0_i32, %c0_i32_0 : i32, i32
  }
  func.func @transform_3(%arg0: i32) -> (i32, i32) {
    %c0_i32 = arith.constant 0 : i32
    %c0_i32_0 = arith.constant 0 : i32
    return %arg0, %c0_i32 : i32, i32
  }
}

</mosaic_0001>

<bundles_post_ra>
// kernel: tpu_custom_call.1
= control target key start
LH: loop header
LB: loop body
LE: loop exit
PB: predicated region body
PF: predicated region fallthrough
CT: control target
= control target key end

     0   :  { %8 = vsyncpa [#allocation3], 0  ;;  %s449_s0 = inlined_call_operand.hbm [shape: s32[8,8], index: 0, kind: input, shape index: {}]   ;;  %s450_s1 = inlined_call_operand.hbm [shape: f32[8,120], index: 1, kind: input, shape index: {}]   ;;  %s451_s2 = inlined_call_operand.hbm [shape: f32[32,256], index: 2, kind: input, shape index: {}]   ;;  %s452_s3 = inlined_call_operand.hbm [shape: f32[8,120], index: 3, kind: output, shape index: {}]  }
   0x1   :  { %9 = vsyncpa [#allocation6], 0 }
   0x2   :  { %10 = vsyncpa [#allocation4], 0  ;;  %s357_s12 = smov [#allocation5]   ;;  %s358_s14 = smov [#allocation2]  }
   0x3   :  { %s27_s13 = sshll.u32 %s357_s12, 4  ;;  %s17_s15 = sshll.u32 %s358_s14, 4  ;;  %s28_s13 = int_to_ptr.vmem [resolvable:$true] %s27_s13  ;;  %s18_s15 = int_to_ptr.vmem [resolvable:$true] %s17_s15 }
   0x4   :  { %s263_s18 = scalar_lea.hbm %s450_s1, 128 }
   0x5   :  { %p264_p0 = scmp.ne.s32.totalorder %s450_s1, %s263_s18  ;;  %p267_p1 = scmp.lt.u32.totalorder %s263_s18, %s450_s1 }
   0x7   :  { %p269_p2 = pnand %p267_p1, %p264_p0 }
   0x9   :  { %272 = shalt.err (!%p269_p2)
}
   0xa   :  { %s273_s23 = scalar_lea.vmem %s28_s13, 128  ;;  %p278_p4 = scmp.lt.s32.totalorder %s28_s13, %s28_s13 }
   0xb   :  { %p274_p3 = scmp.ne.s32.totalorder %s28_s13, %s273_s23  ;;  %p279_p5 = scmp.lt.s32.totalorder %s273_s23, %s273_s23 }
   0xd   :  { %p280_p6 = por %p279_p5, %p278_p4 }
   0xf   :  { %p281_p7 = pnand %p280_p6, %p274_p3 }
  0x11   :  { %284 = shalt.err (!%p281_p7)
}
  0x12   :  { %30 = dma.hbm_to_vmem [thread:$0]  %s450_s1, 128, %s28_s13, [#allocation6]  }
  0x13   :  { %s285_s28 = scalar_lea.hbm %s449_s0, 128 }
  0x14   :  { %p286_p8 = scmp.ne.s32.totalorder %s449_s0, %s285_s28  ;;  %p289_p9 = scmp.lt.u32.totalorder %s285_s28, %s449_s0 }
  0x16   :  { %p291_p10 = pnand %p289_p9, %p286_p8 }
  0x18   :  { %294 = shalt.err (!%p291_p10)
}
  0x19   :  { %s295_s6 = scalar_lea.vmem %s18_s15, 128  ;;  %p300_p12 = scmp.lt.s32.totalorder %s18_s15, %s18_s15 }
  0x1a   :  { %p296_p11 = scmp.ne.s32.totalorder %s18_s15, %s295_s6  ;;  %p301_p13 = scmp.lt.s32.totalorder %s295_s6, %s295_s6 }
  0x1c   :  { %p302_p0 = por %p301_p13, %p300_p12 }
  0x1e   :  { %p303_p1 = pnand %p302_p0, %p296_p11 }
  0x20   :  { %306 = shalt.err (!%p303_p1)
}
  0x21   :  { %20 = dma.hbm_to_vmem [thread:$0]  %s449_s0, 128, %s18_s15, [#allocation3]  }
  0x22   :  { %s359_s8 = smov [#allocation7]   ;;  %s307_s12 = scalar_lea.hbm %s451_s2, 1024 }
  0x23   :  { %s36_s9 = sshll.u32 %s359_s8, 4  ;;  %p308_p2 = scmp.ne.s32.totalorder %s451_s2, %s307_s12  ;;  %s37_s9 = int_to_ptr.vmem [resolvable:$true] %s36_s9 }
  0x24   :  { %p311_p3 = scmp.lt.u32.totalorder %s307_s12, %s451_s2 }
  0x26   :  { %p313_p4 = pnand %p311_p3, %p308_p2 }
  0x28   :  { %316 = shalt.err (!%p313_p4)
}
  0x29   :  { %s317_s18 = scalar_lea.vmem %s37_s9, 1024  ;;  %p322_p6 = scmp.lt.s32.totalorder %s37_s9, %s37_s9 }
  0x2a   :  { %p318_p5 = scmp.ne.s32.totalorder %s37_s9, %s317_s18  ;;  %p323_p7 = scmp.lt.s32.totalorder %s317_s18, %s317_s18 }
  0x2c   :  { %p324_p8 = por %p323_p7, %p322_p6 }
  0x2e   :  { %p325_p9 = pnand %p324_p8, %p318_p5 }
  0x30   :  { %328 = shalt.err (!%p325_p9)
}
  0x31   :  { %s360_s0 = smov 256   ;;  %s361_s15 = smov 16  }
  0x32   :  { %42 = dma.hbm_to_vmem [thread:$0]  %s451_s2, 1024, %s37_s9, [#allocation6], %s360_s0, %s360_s0, %s361_s15  }
  0x33   :  { %351 = dma.done.wait [#allocation3], 128  }
  0x34   :  { %352 = vsyncadd [#allocation3], 4294967168 }
  0x35   :  { %353 = dma.done.wait [#allocation6], 1152  }
  0x36   :  { %354 = vsyncadd [#allocation6], 4294966144  ;;  %v362_v0 = vmov 0   ;;  %v363_v1 = vmov 2   ;;  %v364_v2 = vmov 0.0   ;;  %v52_v3 = vld [vmem:[#allocation2] sm:$0xff]  ;;  %v53_v29 = vlaneseq }
  0x37   :  { %254 = vset.pattern.permute.xlu0 %v362_v0  ;;  %256 = vset.pattern.permute.xlu1 %v363_v1  ;;  %v70_v4 = vadd.s32 8, %v52_v3  ;;  %v62_v5 = vadd.s32 4, %v52_v3  ;;  %v78_v6 = vadd.s32 12, %v52_v3  ;;  %v365_v7 = vmov 1   ;;  %v119_v15 = vld [vmem:[#allocation7 + $0x8] sm:$0xff]  ;;  %v121_v16 = vld [vmem:[#allocation7 + $0x18] sm:$0xff] }
  0x38   :  { %194 = vmatprep.mubr.f32.mxu0 %v364_v2  ;;  %56 = vperm.xlu0 %254, %v52_v3   ;;  %v366_v8 = vmov 3   ;;  %v94_v9 = vadd.s32 20, %v52_v3  ;;  %v86_v10 = vadd.s32 16, %v52_v3  ;;  %v367_v11 = vmov 5   ;;  %v118_v19 = vld [vmem:[#allocation7] sm:$0xff]  ;;  %v120_v20 = vld [vmem:[#allocation7 + $0x10] sm:$0xff] }
  0x39   :  { %72 = vperm.xlu1 %256, %v70_v4   ;;  %v368_v12 = vmov 4   ;;  %v102_v13 = vadd.s32 24, %v52_v3  ;;  %v369_v14 = vmov 7   ;;  %v370_v17 = vmov 6   ;;  %v123_v23 = vld [vmem:[#allocation7 + $0x28] sm:$0xff]  ;;  %v125_v24 = vld [vmem:[#allocation7 + $0x38] sm:$0xff] }
  0x3a   :  { %v231_v18 = vpack.c.bf16 %v121_v16, %v119_v15  ;;  %v233_v21 = vpack.c.bf16 %v120_v20, %v118_v19  ;;  %v110_v22 = vadd.s32 28, %v52_v3  ;;  %v235_v25 = vpack.c.bf16 %v125_v24, %v123_v23  ;;  %v122_v26 = vld [vmem:[#allocation7 + $0x20] sm:$0xff]  ;;  %v124_v27 = vld [vmem:[#allocation7 + $0x30] sm:$0xff]  ;;  %v201_v54 = vld [vmem:[#allocation5] sm:$0xff]  ;;  %s371_s2 = smov [#allocation8]  }
  0x3b   :  { %v237_v28 = vpack.c.bf16 %v124_v27, %v122_v26  ;;  %v54_v30 = vand.u32 127, %v53_v29  ;;  %vm126_vm8 = vcmask 261120   ;;  %s212_s21 = sshll.u32 %s371_s2, 4  ;;  %vm204_vm9 = vcmask 982016   ;;  %s213_s21 = int_to_ptr.vmem [resolvable:$true] %s212_s21 }
  0x3c   :  { %255 = vset.pattern.permute.xlu0 %v365_v7  ;;  %232 = vmatprep.subr.bf16.mxu0 %v231_v18  ;;  %s329_s22 = scalar_lea.vmem %s213_s21, 128  ;;  %p334_p11 = scmp.lt.s32.totalorder %s213_s21, %s213_s21 }
  0x3d   :  { %64 = vperm.xlu0 %255, %v62_v5   ;;  %257 = vset.pattern.permute.xlu1 %v366_v8  ;;  %p330_p10 = scmp.ne.s32.totalorder %s213_s21, %s329_s22  ;;  %p335_p12 = scmp.lt.s32.totalorder %s329_s22, %s329_s22 }
  0x3e   :  { %80 = vperm.xlu1 %257, %v78_v6   ;;  %234 = vmatpush1.bf16.msra.mxu0 %v233_v21 }
  0x3f   :  { %236 = vmatprep.subr.bf16.mxu0 %v235_v25  ;;  %p336_p13 = por %p335_p12, %p334_p11 }
  0x41   :  { %259 = vset.pattern.permute.xlu0 %v367_v11  ;;  %p337_p0 = pnand %p336_p13, %p330_p10 }
  0x42   :  { %96 = vperm.xlu0 %259, %v94_v9   ;;  %258 = vset.pattern.permute.xlu1 %v368_v12 }
  0x43   :  { %88 = vperm.xlu1 %258, %v86_v10   ;;  %238 = vmatpush1.bf16.msra.mxu0 %v237_v28 }
  0x46   :  { %262 = vset.pattern.permute.xlu0 %v369_v14 }
  0x47   :  { %260 = vset.pattern.permute.xlu1 %v370_v17 }
  0x48   :  { %104 = vperm.xlu1 %260, %v102_v13  }
  0x4c   :  { %261 = vset.pattern.permute.xlu1 %v369_v14 }
  0x4d   :  { %112 = vperm.xlu1 %261, %v110_v22  }
  0xb7   :  { %v57_v31 = vpop.permute.xlu0 %56 }
  0xb8   :  { %vm58_vm0 = vcmp.eq.s32.totalorder %v54_v30, %v57_v31  ;;  %v73_v32 = vpop.permute.xlu1 %72 }
  0xb9   :  { %v222_v33 = vsel %vm58_vm0, 1.0, %v364_v2  ;;  %vm74_vm1 = vcmp.eq.s32.totalorder %v54_v30, %v73_v32 }
  0xba   :  { %v224_v38 = vsel %vm74_vm1, 1.0, %v364_v2 }
  0xbc   :  { %v65_v34 = vpop.permute.xlu0 %64 }
  0xbd   :  { %vm66_vm2 = vcmp.eq.s32.totalorder %v54_v30, %v65_v34  ;;  %v81_v36 = vpop.permute.xlu1 %80 }
  0xbe   :  { %v223_v35 = vsel %vm66_vm2, 1.0, %v364_v2  ;;  %vm82_vm3 = vcmp.eq.s32.totalorder %v54_v30, %v81_v36 }
  0xbf   :  { %v69_v37 = vadd.f32 %v223_v35, %v222_v33  ;;  %v225_v41 = vsel %vm82_vm3, 1.0, %v364_v2 }
  0xc1   :  { %v77_v39 = vadd.f32 %v224_v38, %v69_v37  ;;  %v97_v40 = vpop.permute.xlu0 %96 }
  0xc2   :  { %v89_v43 = vpop.permute.xlu1 %88  ;;  %vm98_vm5 = vcmp.eq.s32.totalorder %v54_v30, %v97_v40 }
  0xc3   :  { %v85_v42 = vadd.f32 %v225_v41, %v77_v39  ;;  %vm90_vm4 = vcmp.eq.s32.totalorder %v54_v30, %v89_v43  ;;  %v227_v46 = vsel %vm98_vm5, 1.0, %v364_v2 }
  0xc4   :  { %v226_v44 = vsel %vm90_vm4, 1.0, %v364_v2 }
  0xc5   :  { %v93_v45 = vadd.f32 %v226_v44, %v85_v42 }
  0xc7   :  { %v105_v47 = vpop.permute.xlu1 %104  ;;  %v101_v48 = vadd.f32 %v227_v46, %v93_v45 }
  0xc8   :  { %vm106_vm6 = vcmp.eq.s32.totalorder %v54_v30, %v105_v47 }
  0xc9   :  { %v228_v49 = vsel %vm106_vm6, 1.0, %v364_v2 }
  0xca   :  { %v109_v51 = vadd.f32 %v228_v49, %v101_v48 }
  0xcc   :  { %v113_v50 = vpop.permute.xlu1 %112 }
  0xcd   :  { %vm114_vm7 = vcmp.eq.s32.totalorder %v54_v30, %v113_v50 }
  0xce   :  { %v229_v52 = vsel %vm114_vm7, 1.0, %v364_v2 }
  0xcf   :  { %v117_v53 = vadd.f32 %v229_v52, %v109_v51 }
  0xd1   :  { %230 = vmatmul.mubr.msk.f32.vlgmr.msra.gmra.mrb[0].mxu0 %vm126_vm8, %v117_v53 }
 0x1a4   :  { %v196_v55 = vpop.f32.mrb[0].mxu0 }
 0x1a5   :  { %v202_v56 = vmul.f32 %v201_v54, %v196_v55  ;;  %v198_v57 = vpop.f32.mrb[1].mxu0 }
 0x1a7   :  { %v203_v58 = vadd.f32 %v202_v56, %v198_v57 }
 0x1a9   :  { %205 = vst.msk [vmem:[#allocation8] sm:$0xff] %vm204_vm9, %v203_v58 }
 0x1aa   :  { %340 = shalt.err (!%p337_p0)
}
 0x1ab   :  { %s341_s25 = scalar_lea.hbm %s452_s3, 128 }
 0x1ac   :  { %p342_p1 = scmp.ne.s32.totalorder %s452_s3, %s341_s25  ;;  %p345_p2 = scmp.lt.u32.totalorder %s341_s25, %s452_s3 }
 0x1ae   :  { %p347_p3 = pnand %p345_p2, %p342_p1 }
 0x1b0   :  { %350 = shalt.err (!%p347_p3)
}
 0x1b1   :  { %215 = dma.vmem_to_hbm [thread:$0]  %s213_s21, 128, %s452_s3, [#allocation4]  }
 0x1b2   :  { %355 = dma.done.wait [#allocation4], 128  }
 0x1b3   :  { %356 = vsyncadd [#allocation4], 4294967168 }
 0x1b4   :  { %219 = vsyncpa [#allocation3], 1 }
 0x1b5   :  { %220 = vsyncpa [#allocation6], 1 }
 0x1b6   :  { %221 = vsyncpa [#allocation4], 1 }

</bundles_post_ra>
